<compile_context>
chip_gen: v6e
topology: v6e:2x2x1
jax: 0.10.0
libtpu: 0.0.40
codegen_flags: <defaults>
</compile_context>

<pallas_src>
import functools

import jax
import jax.numpy as jnp
from jax.experimental import pallas as pl
from jax.experimental.pallas import tpu as pltpu

LN_EPS = 1e-5
ROW_ALIGN = 16            # bf16 sublane packing: keep row tiles a multiple of 16
MAX_TILE_ROWS = 2048      # upper cap on rows per grid step


# ----------------------------- small helpers --------------------------------


def _round_up(n, m):
    return ((n + m - 1) // m) * m


def _pad_rows(a, rows):
    n = a.shape[0]
    if n == rows:
        return a
    return jnp.pad(a, [(0, rows - n)] + [(0, 0)] * (a.ndim - 1))


@functools.lru_cache(maxsize=None)
def _vmem_capacity_bytes():
    try:
        info = pltpu.get_tpu_info()
        cap = getattr(info, "vmem_capacity_bytes", None)
        if cap:
            return int(cap)
    except Exception:
        pass
    return 128 * 1024 * 1024   # v5e / v6e default


def _vmem_limit_bytes():
    # Headroom under physical VMEM: ~48 MiB on v7x (64 MiB physical),
    # ~96 MiB on v5e / v6e (128 MiB physical).
    return min(3 * _vmem_capacity_bytes() // 4, 96 * 1024 * 1024)


def _target_step_bytes():
    # Amortize the ~0.35 us fixed per-grid-step cost: v7x-class chips
    # (<=64 MiB VMEM, ~3.2 TB/s HBM) want >=1 MB per step, older gens ~0.5 MB.
    if _vmem_capacity_bytes() <= 64 * 1024 * 1024:
        return 5 * 256 * 1024          # 1.25 MiB
    return 512 * 1024


def _pick_tile(n_rows, row_bytes):
    """Rows per grid step, sized by streamed bytes per step."""
    n_al = _round_up(max(n_rows, 1), ROW_ALIGN)
    tile = _round_up(max(_target_step_bytes() // max(row_bytes, 1), ROW_ALIGN),
                     ROW_ALIGN)
    tile = min(tile, MAX_TILE_ROWS, n_al)
    # v7x megacore: make sure the ("parallel",) row grid has >= 2 steps whenever
    # there are enough rows so both TensorCores get work (no effect on v5e/v6e).
    if n_al <= tile and n_al >= 2 * ROW_ALIGN:
        tile = _round_up(-(-n_al // 2), ROW_ALIGN)
    return tile


# ----------------------------- kernels ---------------------------------------


def _node_kernel(emb_ref, pos_ref, w_ref, c_ref, o_ref):
    # c_ref packs the loop-invariant (1, H) vectors into one (8, H) block:
    #   row 0: linear bias   row 1: LN gamma   row 2: LN beta
    #   row 3: PE inv_freq   row 4: PE phase (0 for sin lanes, pi/2 for cos)
    h = jnp.dot(emb_ref[...], w_ref[...], preferred_element_type=jnp.float32)
    h = h + c_ref[0:1, :]
    # LayerNorm over last dim (biased variance, eps=1e-5, affine), all f32.
    mean = jnp.mean(h, axis=-1, keepdims=True)
    var = jnp.mean(jnp.square(h - mean), axis=-1, keepdims=True)
    hn = (h - mean) * jax.lax.rsqrt(var + LN_EPS)
    hn = hn * c_ref[1:2, :] + c_ref[2:3, :]
    # Sinusoidal positional encoding with a single transcendental per element:
    #   cos(x) = sin(x + pi/2)  ->  pe = sin(pos * inv_freq + phase)
    pe = jnp.sin(pos_ref[...] * c_ref[3:4, :] + c_ref[4:5, :])
    o_ref[...] = (hn + pe).astype(o_ref.dtype)


def _edge_kernel(e_ref, w_ref, c_ref, o_ref):
    # c_ref rows: 0 bias, 1 gamma, 2 beta.  edge_attr arrives f32 straight from
    # the caller (no wrapper-side cast round trip); cast right before the dot.
    h = jnp.dot(e_ref[...].astype(jnp.bfloat16), w_ref[...],
                preferred_element_type=jnp.float32)
    h = h + c_ref[0:1, :]
    mean = jnp.mean(h, axis=-1, keepdims=True)
    var = jnp.mean(jnp.square(h - mean), axis=-1, keepdims=True)
    hn = (h - mean) * jax.lax.rsqrt(var + LN_EPS)
    o_ref[...] = (hn * c_ref[1:2, :] + c_ref[2:3, :]).astype(o_ref.dtype)


# --------------------------- pallas wrappers ---------------------------------


def _node_call(attr_emb, pos, w, consts, tile, out_dtype=jnp.bfloat16):
    n_pad, f = attr_emb.shape
    h = w.shape[1]
    grid = (n_pad // tile,)
    return pl.pallas_call(
        _node_kernel,
        out_shape=jax.ShapeDtypeStruct((n_pad, h), out_dtype),
        grid=grid,
        in_specs=[
            pl.BlockSpec((tile, f), lambda i: (i, 0)),   # gathered attr embeds (bf16)
            pl.BlockSpec((tile, 1), lambda i: (i, 0)),   # event ordering (f32)
            pl.BlockSpec((f, h), lambda i: (0, 0)),      # linear weight (bf16)
            pl.BlockSpec((8, h), lambda i: (0, 0)),      # packed invariants (f32)
        ],
        out_specs=pl.BlockSpec((tile, h), lambda i: (i, 0)),
        compiler_params=pltpu.CompilerParams(
            dimension_semantics=("parallel",),
            vmem_limit_bytes=_vmem_limit_bytes()),
    )(attr_emb, pos, w, consts)


def edge_transform(edge_attr, w, consts, out_dtype=jnp.bfloat16):
    e, d = edge_attr.shape
    h = w.shape[1]
    row_bytes = d * 4 + h * 2                 # f32 read + bf16 write per row
    tile = _pick_tile(e, row_bytes)
    e_pad = _round_up(e, tile)
    edge_p = _pad_rows(edge_attr, e_pad)      # narrow (E, d) pad only
    out = pl.pallas_call(
        _edge_kernel,
        out_shape=jax.ShapeDtypeStruct((e_pad, h), out_dtype),
        grid=(e_pad // tile,),
        in_specs=[
            pl.BlockSpec((tile, d), lambda i: (i, 0)),   # edge features (f32)
            pl.BlockSpec((d, h), lambda i: (0, 0)),      # linear weight (bf16)
            pl.BlockSpec((8, h), lambda i: (0, 0)),      # packed invariants (f32)
        ],
        out_specs=pl.BlockSpec((tile, h), lambda i: (i, 0)),
        compiler_params=pltpu.CompilerParams(
            dimension_semantics=("parallel",),
            vmem_limit_bytes=_vmem_limit_bytes()),
    )(edge_p, w, consts)
    return out[:e]


# ------------------------------ module glue ----------------------------------


def _posenc_consts(hidden):
    d = jnp.arange(hidden, dtype=jnp.int32)
    half = (d // 2).astype(jnp.float32)
    inv_freq = jnp.exp(-jnp.log(10000.0) * (2.0 * half) / float(hidden))
    phase = jnp.where(d % 2 == 0, 0.0, jnp.pi / 2.0).astype(jnp.float32)
    return inv_freq, phase


def _pack_consts(rows, hidden):
    c = jnp.zeros((8, hidden), jnp.float32)
    for i, r in enumerate(rows):
        c = c.at[i].set(r.reshape(-1).astype(jnp.float32))
    return c


def init_params(key, node_dim, edge_dim, hidden_dim):
    num_attr = node_dim - 1
    ks = jax.random.split(key, 4)
    # Weights / embedding tables stored directly in bf16 (no per-call wrapper
    # cast -> no extra HBM round trip).  LN/bias params stay f32.
    # TODO(synk): bf16 params deviate numerically from an f32 PyTorch reference.
    return {
        "attr_tables": (0.1 * jax.random.normal(
            ks[0], (num_attr, 1000, hidden_dim), jnp.float32)).astype(jnp.bfloat16),
        "node_w": (0.05 * jax.random.normal(
            ks[1], (hidden_dim * num_attr, hidden_dim), jnp.float32)
                   ).astype(jnp.bfloat16),
        "node_b": jnp.zeros((hidden_dim,), jnp.float32),
        "node_gamma": jnp.ones((hidden_dim,), jnp.float32),
        "node_beta": jnp.zeros((hidden_dim,), jnp.float32),
        "edge_w": (0.05 * jax.random.normal(
            ks[2], (edge_dim, hidden_dim), jnp.float32)).astype(jnp.bfloat16),
        "edge_b": jnp.zeros((hidden_dim,), jnp.float32),
        "edge_gamma": jnp.ones((hidden_dim,), jnp.float32),
        "edge_beta": jnp.zeros((hidden_dim,), jnp.float32),
    }


def second_view_pre_layer(params, x, edge_attr, *, hidden_dim):
    """x: [N, node_dim] int32 (col 0 = event ordering), edge_attr: [E, edge_dim] f32."""
    n, node_dim = x.shape
    num_attr = node_dim - 1
    h = hidden_dim
    tables = params["attr_tables"]                     # (num_attr, 1000, H) bf16
    vocab = tables.shape[1]

    inv_freq, phase = _posenc_consts(h)
    node_consts = _pack_consts(
        [params["node_b"], params["node_gamma"], params["node_beta"],
         inv_freq, phase], h)
    edge_consts = _pack_consts(
        [params["edge_b"], params["edge_gamma"], params["edge_beta"]], h)

    # --- node path ---
    # Row tile picked from streamed bytes per row (bf16 embeds + ordering + bf16 out).
    emb_row_bytes = num_attr * h * 2 + 4 + h * 2
    tile_n = _pick_tile(n, emb_row_bytes)
    n_pad = _round_up(n, tile_n)

    # Pad only the tiny integer input; the wide bf16 activation produced by the
    # XLA-side gather then comes out already padded (no second wide-array copy).
    # Padded rows gather table row 0 / ordering 0 -> finite, sliced off below.
    x_p = _pad_rows(x, n_pad)
    ids = x_p[:, 1:] + (jnp.arange(num_attr, dtype=jnp.int32) * vocab)[None, :]
    flat_tables = tables.reshape(num_attr * vocab, h)
    # TODO(synk): in-kernel fusion of this vocab-1000 gather needs a multi-vreg
    # sublane dynamic gather Mosaic does not lower reliably; kept in XLA.
    attr_emb = flat_tables[ids.reshape(-1)].reshape(n_pad, num_attr * h)  # bf16
    pos = x_p[:, 0:1].astype(jnp.float32)

    node_h = _node_call(attr_emb, pos, params["node_w"], node_consts, tile_n)[:n]

    # --- edge path ---
    edge_h = edge_transform(edge_attr, params["edge_w"], edge_consts)
    return node_h, edge_h


if __name__ == "__main__":
    node_dim = 4        # -> num_attr = 3
    edge_dim = 8
    hidden_dim = 32
    N, E = 8, 16

    key = jax.random.PRNGKey(0)
    k_param, k_attr, k_edge = jax.random.split(key, 3)
    params = init_params(k_param, node_dim, edge_dim, hidden_dim)

    ordering = jnp.arange(N, dtype=jnp.int32)[:, None]                 # event order
    attrs = jax.random.randint(k_attr, (N, node_dim - 1), 0, 1000, jnp.int32)
    x = jnp.concatenate([ordering, attrs], axis=-1)                    # [N, node_dim]
    edge_attr = jax.random.normal(k_edge, (E, edge_dim), jnp.float32)  # [E, edge_dim]

    node_h, edge_h = second_view_pre_layer(params, x, edge_attr, hidden_dim=hidden_dim)
    jax.block_until_ready((node_h, edge_h))

    assert node_h.shape == (N, hidden_dim) and edge_h.shape == (E, hidden_dim)
    assert bool(jnp.isfinite(node_h.astype(jnp.float32)).all())
    assert bool(jnp.isfinite(edge_h.astype(jnp.float32)).all())
    print("KERNEL_OK")
</pallas_src>

<mosaic_0001>
module attributes {stable_mosaic.version = 11 : i64} {
  func.func @_node_kernel(%arg0: i32, %arg1: memref<16x96xbf16, #tpu.memory_space<vmem>>, %arg2: memref<16x1xf32, #tpu.memory_space<vmem>>, %arg3: memref<96x32xbf16, #tpu.memory_space<vmem>>, %arg4: memref<8x32xf32, #tpu.memory_space<vmem>>, %arg5: memref<16x32xbf16, #tpu.memory_space<vmem>>) attributes {dimension_semantics = [#tpu.dimension_semantics<parallel>], iteration_bounds = array<i64: 1>, scalar_prefetch = 0 : i64, scratch_operands = 0 : i64, tpu.core_type = #tpu.core_type<tc>, window_params = [{transform_indices = @transform_0, window_bounds = array<i64: 16, 96>}, {transform_indices = @transform_1, window_bounds = array<i64: 16, 1>}, {pipeline_mode = #tpu.pipeline_mode<synchronous>, transform_indices = @transform_2, window_bounds = array<i64: 96, 32>}, {pipeline_mode = #tpu.pipeline_mode<synchronous>, transform_indices = @transform_3, window_bounds = array<i64: 8, 32>}, {transform_indices = @transform_4, window_bounds = array<i64: 16, 32>}]} {
    %c0 = arith.constant 0 : index
    %c0_0 = arith.constant 0 : index
    %0 = vector.load %arg1[%c0, %c0_0] : memref<16x96xbf16, #tpu.memory_space<vmem>>, vector<16x96xbf16>
    %c0_1 = arith.constant 0 : index
    %c0_2 = arith.constant 0 : index
    %1 = vector.load %arg3[%c0_1, %c0_2] : memref<96x32xbf16, #tpu.memory_space<vmem>>, vector<96x32xbf16>
    %cst = arith.constant dense<0.000000e+00> : vector<16x32xf32>
    %2 = tpu.matmul %0, %1, %cst {dimension_numbers = #tpu.dot_dimension_numbers<[1], [0], [0], [1], [0, 0, 1, 1], [], []>} : vector<16x96xbf16>, vector<96x32xbf16>, vector<16x32xf32> -> vector<16x32xf32>
    %c0_3 = arith.constant 0 : index
    %c0_4 = arith.constant 0 : index
    %3 = vector.load %arg4[%c0_3, %c0_4] : memref<8x32xf32, #tpu.memory_space<vmem>>, vector<1x32xf32>
    %4 = vector.broadcast %3 : vector<1x32xf32> to vector<16x32xf32>
    %5 = arith.addf %2, %4 : vector<16x32xf32>
    %cst_5 = arith.constant dense<0.000000e+00> : vector<16xf32>
    %6 = vector.multi_reduction <add>, %5, %cst_5 [1] : vector<16x32xf32> to vector<16xf32>
    %7 = vector.shape_cast %6 : vector<16xf32> to vector<16x1xf32>
    %cst_6 = arith.constant 3.200000e+01 : f32
    %8 = vector.broadcast %cst_6 : f32 to vector<16x1xf32>
    %9 = arith.divf %7, %8 : vector<16x1xf32>
    %10 = vector.broadcast %9 : vector<16x1xf32> to vector<16x32xf32>
    %11 = arith.subf %5, %10 : vector<16x32xf32>
    %12 = arith.mulf %11, %11 : vector<16x32xf32>
    %cst_7 = arith.constant dense<0.000000e+00> : vector<16xf32>
    %13 = vector.multi_reduction <add>, %12, %cst_7 [1] : vector<16x32xf32> to vector<16xf32>
    %14 = vector.shape_cast %13 : vector<16xf32> to vector<16x1xf32>
    %cst_8 = arith.constant 3.200000e+01 : f32
    %15 = vector.broadcast %cst_8 : f32 to vector<16x1xf32>
    %16 = arith.divf %14, %15 : vector<16x1xf32>
    %17 = vector.broadcast %9 : vector<16x1xf32> to vector<16x32xf32>
    %18 = arith.subf %5, %17 : vector<16x32xf32>
    %cst_9 = arith.constant 9.99999974E-6 : f32
    %19 = vector.broadcast %cst_9 : f32 to vector<16x1xf32>
    %20 = arith.addf %16, %19 : vector<16x1xf32>
    %21 = math.rsqrt %20 : vector<16x1xf32>
    %22 = vector.broadcast %21 : vector<16x1xf32> to vector<16x32xf32>
    %23 = arith.mulf %18, %22 : vector<16x32xf32>
    %c1 = arith.constant 1 : index
    %c0_10 = arith.constant 0 : index
    %24 = vector.load %arg4[%c1, %c0_10] : memref<8x32xf32, #tpu.memory_space<vmem>>, vector<1x32xf32>
    %25 = vector.broadcast %24 : vector<1x32xf32> to vector<16x32xf32>
    %26 = arith.mulf %23, %25 : vector<16x32xf32>
    %c2 = arith.constant 2 : index
    %c0_11 = arith.constant 0 : index
    %27 = vector.load %arg4[%c2, %c0_11] : memref<8x32xf32, #tpu.memory_space<vmem>>, vector<1x32xf32>
    %28 = vector.broadcast %27 : vector<1x32xf32> to vector<16x32xf32>
    %29 = arith.addf %26, %28 : vector<16x32xf32>
    %c0_12 = arith.constant 0 : index
    %c0_13 = arith.constant 0 : index
    %30 = vector.load %arg2[%c0_12, %c0_13] : memref<16x1xf32, #tpu.memory_space<vmem>>, vector<16x1xf32>
    %c3 = arith.constant 3 : index
    %c0_14 = arith.constant 0 : index
    %31 = vector.load %arg4[%c3, %c0_14] : memref<8x32xf32, #tpu.memory_space<vmem>>, vector<1x32xf32>
    %32 = vector.broadcast %30 : vector<16x1xf32> to vector<16x32xf32>
    %33 = vector.broadcast %31 : vector<1x32xf32> to vector<16x32xf32>
    %34 = arith.mulf %32, %33 : vector<16x32xf32>
    %c4 = arith.constant 4 : index
    %c0_15 = arith.constant 0 : index
    %35 = vector.load %arg4[%c4, %c0_15] : memref<8x32xf32, #tpu.memory_space<vmem>>, vector<1x32xf32>
    %36 = vector.broadcast %35 : vector<1x32xf32> to vector<16x32xf32>
    %37 = arith.addf %34, %36 : vector<16x32xf32>
    %38 = math.sin %37 : vector<16x32xf32>
    %39 = arith.addf %29, %38 : vector<16x32xf32>
    %40 = arith.truncf %39 : vector<16x32xf32> to vector<16x32xbf16>
    %c0_16 = arith.constant 0 : index
    %c0_17 = arith.constant 0 : index
    %41 = vector.load %arg5[%c0_16, %c0_17] : memref<16x32xbf16, #tpu.memory_space<vmem>>, vector<16x32xbf16>
    tpu.vector_store %arg5[%c0_16, %c0_17], %40 {strides = array<i32>} : memref<16x32xbf16, #tpu.memory_space<vmem>>, vector<16x32xbf16>,
    return
  }
  func.func @transform_0(%arg0: i32) -> (i32, i32) {
    %c0_i32 = arith.constant 0 : i32
    %c0_i32_0 = arith.constant 0 : i32
    return %arg0, %c0_i32 : i32, i32
  }
  func.func @transform_1(%arg0: i32) -> (i32, i32) {
    %c0_i32 = arith.constant 0 : i32
    %c0_i32_0 = arith.constant 0 : i32
    return %arg0, %c0_i32 : i32, i32
  }
  func.func @transform_2(%arg0: i32) -> (i32, i32) {
    %c0_i32 = arith.constant 0 : i32
    %c0_i32_0 = arith.constant 0 : i32
    %c0_i32_1 = arith.constant 0 : i32
    return %c0_i32, %c0_i32_0 : i32, i32
  }
  func.func @transform_3(%arg0: i32) -> (i32, i32) {
    %c0_i32 = arith.constant 0 : i32
    %c0_i32_0 = arith.constant 0 : i32
    %c0_i32_1 = arith.constant 0 : i32
    return %c0_i32, %c0_i32_0 : i32, i32
  }
  func.func @transform_4(%arg0: i32) -> (i32, i32) {
    %c0_i32 = arith.constant 0 : i32
    %c0_i32_0 = arith.constant 0 : i32
    return %arg0, %c0_i32 : i32, i32
  }
}

</mosaic_0001>

<bundles_post_ra>
// kernel: tpu_custom_call.1
= control target key start
LH: loop header
LB: loop body
LE: loop exit
PB: predicated region body
PF: predicated region fallthrough
CT: control target
= control target key end

     0   :  { %v540_v1 = vmov 0.0   ;;  %vm541_vm0 = vmmov 0   ;;  %s783_s0 = inlined_call_operand.vmem [shape: bf16[16,96], index: 0, kind: input, shape index: {}]   ;;  %s784_s1 = inlined_call_operand.vmem [shape: f32[16,1], index: 1, kind: input, shape index: {}]   ;;  %s785_s2 = inlined_call_operand.vmem [shape: bf16[96,32], index: 2, kind: input, shape index: {}]   ;;  %s786_s3 = inlined_call_operand.vmem [shape: f32[8,32], index: 3, kind: input, shape index: {}]   ;;  %s787_s4 = inlined_call_operand.hbm [shape: bf16[16,32], index: 4, kind: output, shape index: {}]  }
   0x1   :  { %v499_v0 = vld [vmem:[%s785_s2 + $0x28] sm:$0xff]   ;;  %461 = vmatprep.subr.bf16.mxu0 %v540_v1  ;;  %v500_v2 = vld [vmem:[%s785_s2 + $0x20] sm:$0xff]   ;;  %473 = vmatprep.mubr.msk.bf16.mxu0 %vm541_vm0, %v540_v1  ;;  %v501_v3 = vld [vmem:[%s785_s2 + $0x18] sm:$0xff]  }
   0x2   :  { %462 = vmatpush3.bf16.msra.mxu0 %v499_v0 }
   0x3   :  { %463 = vmatprep.subr.bf16.mxu0 %v540_v1 }
   0x6   :  { %464 = vmatpush3.bf16.msra.mxu0 %v500_v2 }
   0x7   :  { %465 = vmatprep.subr.bf16.mxu0 %v540_v1 }
   0x8   :  { %9 = vsyncpa [#allocation3], 0  ;;  %v502_v4 = vld [vmem:[%s785_s2 + $0x10] sm:$0xff]   ;;  %v503_v5 = vld [vmem:[%s785_s2 + $0x8] sm:$0xff]   ;;  %vm79_vm1 = vcmask 785408   ;;  %v542_v9 = vmov 0  }
   0x9   :  { %v504_v6 = vld [vmem:[%s785_s2] sm:$0xff]   ;;  %497 = vset.pattern.permute.xlu1 %v542_v9  ;;  %498 = vset.pattern.permute.xlu0 %v542_v9  ;;  %v167_v10 = vld [vmem:[%s784_s1 + $0x8] sm:$0xff]  ;;  %vm124_vm2 = vcmask 261120   ;;  %v543_v53 = vmov 683565275  }
   0xa   :  { %466 = vmatpush3.bf16.msra.mxu0 %v501_v3  ;;  %v505_v7 = vld [vmem:[%s783_s0] sm:$0xff]   ;;  %v544_v55 = vmov 2475754826   ;;  %v545_v57 = vmov 2102212464  }
   0xb   :  { %467 = vmatprep.subr.bf16.mxu0 %v540_v1  ;;  %v166_v8 = vld [vmem:[%s784_s1] sm:$0xff]  ;;  %v546_v59 = vmov 920167782   ;;  %v547_v63 = vmov 1326507024  }
   0xc   :  { %171 = vperm.xlu1 %497, %v166_v8   ;;  %v429_v11 = vld [vmem:[%s786_s3] ss:$0 sm:$0xff]  ;;  %v440_v21 = vld [vmem:[%s786_s3 + $0x3] ss:$0 sm:$0xff]  ;;  %v441_v23 = vld [vmem:[%s786_s3 + $0x4] ss:$0 sm:$0xff] }
   0xd   :  { %v548_v2 = vmov 2131351028  }
   0xe   :  { %468 = vmatpush3.bf16.msra.mxu0 %v502_v4 }
   0xf   :  { %469 = vmatprep.subr.bf16.mxu0 %v540_v1 }
  0x10   :  { %176 = vperm.xlu1 %497, %v167_v10  }
  0x12   :  { %470 = vmatpush3.bf16.msra.mxu0 %v503_v5 }
  0x13   :  { %471 = vmatprep.subr.bf16.mxu0 %v540_v1 }
  0x16   :  { %472 = vmatpush3.bf16.msra.mxu0 %v504_v6 }
  0x19   :  { %474 = vmatmul.mubr.msk.bf16.vlgmr.msra.gmra.mxu0 %vm79_vm1, %v505_v7 }
  0x87   :  { %v172_v20 = vpop.permute.xlu1 %171 }
  0x88   :  { %v183_v22 = vmul.f32 %v440_v21, %v172_v20 }
  0x8a   :  { %v615_v25 = vadd.f32 %v441_v23, %v183_v22 }
  0x8b   :  { %v177_v24 = vpop.permute.xlu1 %176 }
  0x8c   :  { %v184_v27 = vmul.f32 %v440_v21, %v177_v24  ;;  %v195_v30 = vand.u32 2139095040, %v615_v25  ;;  %v192_v51 = vand.u32 2147483647, %v615_v25  ;;  %vm194_vm1 = vcmp.lt.s32.totalorder %v615_v25, 0 }
  0x8e   :  { %v620_v31 = vadd.f32 %v441_v23, %v184_v27  ;;  %v196_v37 = vshrl.u32 %v195_v30, 23  ;;  %v199_v6 = vand.u32 8388607, %v192_v51 }
  0x90   :  { %v299_v38 = vand.u32 2139095040, %v620_v31  ;;  %v442_v41 = vadd.s32 4294967169, %v196_v37  ;;  %v296_v7 = vand.u32 2147483647, %v620_v31  ;;  %v200_v24 = vor.u32 8388608, %v199_v6 }
  0x92   :  { %v300_v42 = vshrl.u32 %v299_v38, 23  ;;  %v202_v43 = vadd.s32 1, %v442_v41  ;;  %v303_v30 = vand.u32 8388607, %v296_v7 }
  0x94   :  { %v446_v44 = vadd.s32 4294967169, %v300_v42  ;;  %vm203_vm3 = vcmp.gt.s32.totalorder %v202_v43, 0  ;;  %v240_v42 = vshll.u32 %v200_v24, 8 }
  0x95   :  { %v204_v46 = vsel %vm203_vm3, %v202_v43, 0  ;;  %v304_v43 = vor.u32 8388608, %v303_v30  ;;  %vm298_vm3 = vcmp.lt.s32.totalorder %v620_v31, 0 }
  0x96   :  { %v306_v45 = vadd.s32 1, %v446_v44  ;;  %v206_v47 = vand.u32 31, %v204_v46  ;;  %v634_v52 = vshrl.u32 %v204_v46, 5 }
  0x98   :  { %vm307_vm4 = vcmp.gt.s32.totalorder %v306_v45, 0  ;;  %v631_v49 = vsub.s32 32, %v206_v47  ;;  %v209_v54 = vshll.u32 %v543_v53, %v206_v47  ;;  %v218_v58 = vshll.u32 %v545_v57, %v206_v47 }
  0x99   :  { %v308_v48 = vsel %vm307_vm4, %v306_v45, 0  ;;  %v221_v62 = vshll.u32 %v546_v59, %v206_v47  ;;  %v212_v1 = vshll.u32 %v544_v55, %v206_v47  ;;  %v215_v4 = vshll.u32 %v548_v2, %v206_v47 }
  0x9a   :  { %v310_v50 = vand.u32 31, %v308_v48  ;;  %v210_v56 = vshrl.u32 %v544_v55, %v631_v49  ;;  %v219_v60 = vshrl.u32 %v546_v59, %v631_v49  ;;  %v222_v0 = vshrl.u32 %v547_v63, %v631_v49 }
  0x9b   :  { %v213_v3 = vshrl.u32 %v548_v2, %v631_v49  ;;  %v216_v5 = vshrl.u32 %v545_v57, %v631_v49  ;;  %vm224_vm5 = vcmp.lt.s32.totalorder %v634_v52, 1  ;;  %vm227_vm6 = vcmp.lt.s32.totalorder %v634_v52, 4 }
  0x9c   :  { %v639_v61 = vsub.s32 32, %v310_v50  ;;  %v211_v8 = vor.u32 %v210_v56, %v209_v54  ;;  %v220_v9 = vor.u32 %v219_v60, %v218_v58  ;;  %v322_v10 = vshll.u32 %v545_v57, %v310_v50 }
  0x9d   :  { %v319_v22 = vshll.u32 %v548_v2, %v310_v50  ;;  %vm226_vm7 = vcmp.lt.s32.totalorder %v634_v52, 3  ;;  %vm225_vm9 = vcmp.lt.s32.totalorder %v634_v52, 2  ;;  %v344_v58 = vshll.u32 %v304_v43, 8 }
  0x9e   :  { %v314_v20 = vshrl.u32 %v544_v55, %v639_v61  ;;  %v317_v21 = vshrl.u32 %v548_v2, %v639_v61  ;;  %v320_v23 = vshrl.u32 %v545_v57, %v639_v61  ;;  %vm753_vm4 = vcmp.le.f32.partialorder %v296_v7, 0.7853982 }
  0xd9   :  { %v117_v12 = vpop.f32.mrf.mxu0 }
  0xda   :  { %v118_v13 = vadd.f32 %v429_v11, %v117_v12  ;;  %v223_v12 = vor.u32 %v222_v0, %v221_v62 }
  0xdb   :  { %v475_v14 = vpop.f32.mrf.mxu0 }
  0xdc   :  { %v125_v15 = vsel %vm124_vm2, %v118_v13, 0.0  ;;  %v325_v14 = vshll.u32 %v546_v59, %v310_v50 }
  0xdd   :  { %126 = vadd.xlane.f32.xlu0 %v125_v15  ;;  %v120_v16 = vpop.f32.mrf.mxu0  ;;  %v326_v15 = vshrl.u32 %v547_v63, %v639_v61 }
  0xde   :  { %v121_v17 = vadd.f32 %v429_v11, %v120_v16  ;;  %v323_v11 = vshrl.u32 %v546_v59, %v639_v61  ;;  %v214_v16 = vor.u32 %v213_v3, %v212_v1 }
  0xdf   :  { %v476_v18 = vpop.f32.mrf.mxu0 }
  0xe0   :  { %v128_v19 = vsel %vm124_vm2, %v121_v17, 0.0  ;;  %v313_v18 = vshll.u32 %v543_v53, %v310_v50  ;;  %v324_v27 = vor.u32 %v323_v11, %v322_v10 }
  0xe1   :  { %129 = vadd.xlane.f32.xlu0 %v128_v19  ;;  %v316_v19 = vshll.u32 %v544_v55, %v310_v50  ;;  %v208_v55 = vshrl.u32 %v543_v53, %v631_v49 }
  0xe2   :  { %v315_v37 = vor.u32 %v314_v20, %v313_v18 }
  0xe3   :  { %v318_v38 = vor.u32 %v317_v21, %v316_v19  ;;  %v228_v1 = vsel %vm224_vm5, %v208_v55, %v211_v8 }
 0x166   :  { %v127_v26 = vpop.xlane.xlu0 %126 }
 0x167   :  { %v132_v28 = vmul.f32 0.03125, %v127_v26  ;;  %v233_v26 = vsel %vm227_vm6, %v220_v9, 920167782 }
 0x169   :  { %v617_v29 = vsub.f32 %v118_v13, %v132_v28  ;;  %v650_v13 = vshrl.u32 %v308_v48, 5  ;;  %v237_v28 = vsel %vm227_vm6, %v223_v12, 1326507024 }
 0x16a   :  { %v130_v32 = vpop.xlane.xlu0 %129 }
 0x16b   :  { %v133_v33 = vmul.f32 0.03125, %v130_v32  ;;  %v136_v34 = vmul.f32 %v617_v29, %v617_v29  ;;  %v327_v32 = vor.u32 %v326_v15, %v325_v14  ;;  %vm331_vm8 = vcmp.lt.s32.totalorder %v650_v13, 4 }
 0x16c   :  { %vm328_vm10 = vcmp.lt.s32.totalorder %v650_v13, 1  ;;  %vm330_vm11 = vcmp.lt.s32.totalorder %v650_v13, 3  ;;  %v337_v41 = vsel %vm331_vm8, %v324_v27, 920167782  ;;  %vm329_vm12 = vcmp.lt.s32.totalorder %v650_v13, 2 }
 0x16d   :  { %v624_v35 = vsub.f32 %v121_v17, %v133_v33  ;;  %v138_v36 = vsel %vm124_vm2, %v136_v34, 0.0  ;;  %v217_v17 = vor.u32 %v216_v5, %v215_v4  ;;  %v232_v33 = vsel %vm224_vm5, %v211_v8, %v214_v16 }
 0x16e   :  { %139 = vadd.xlane.f32.xlu0 %v138_v36  ;;  %v341_v44 = vsel %vm331_vm8, %v327_v32, 1326507024  ;;  %v336_v47 = vsel %vm328_vm10, %v315_v37, %v318_v38  ;;  %v312_v4 = vshrl.u32 %v543_v53, %v639_v61 }
 0x16f   :  { %v137_v39 = vmul.f32 %v624_v35, %v624_v35  ;;  %v236_v34 = vsel %vm224_vm5, %v214_v16, %v217_v17  ;;  %v234_v36 = vsel %vm226_vm7, %v217_v17, %v233_v26  ;;  %v342_v54 = vsel %vm330_vm11, %v324_v27, %v341_v44 }
 0x170   :  { %v235_v45 = vsel %vm225_vm9, %v232_v33, %v234_v36  ;;  %v229_v63 = vsel %vm227_vm6, %v217_v17, 2102212464  ;;  %v332_v11 = vsel %vm328_vm10, %v312_v4, %v315_v37 }
 0x171   :  { %v141_v40 = vsel %vm124_vm2, %v137_v39, 0.0  ;;  %v321_v39 = vor.u32 %v320_v23, %v319_v22  ;;  %v695_v56 = vmul.u32.u64.low %v240_v42, %v235_v45  ;;  %v696_v57 = vmul.u32.u64.high %v240_v42, %v235_v45, %v695_v56 }
 0x172   :  { %142 = vadd.xlane.f32.xlu1 %v141_v40  ;;  %v238_v40 = vsel %vm226_vm7, %v220_v9, %v237_v28  ;;  %v230_v3 = vsel %vm226_vm7, %v214_v16, %v229_v63  ;;  %vm743_vm2 = vcmp.le.f32.partialorder %v192_v51, 0.7853982 }
 0x173   :  { %v239_v46 = vsel %vm225_vm9, %v236_v34, %v238_v40  ;;  %v338_v48 = vsel %vm330_vm11, %v321_v39, %v337_v41  ;;  %v340_v50 = vsel %vm328_vm10, %v318_v38, %v321_v39  ;;  %v333_v9 = vsel %vm331_vm8, %v321_v39, 2102212464 }
 0x174   :  { %v698_v59 = vmul.u32.u64.low %v240_v42, %v239_v46  ;;  %v699_v60 = vmul.u32.u64.high %v240_v42, %v239_v46, %v698_v59  ;;  %v339_v62 = vsel %vm329_vm12, %v336_v47, %v338_v48  ;;  %v343_v0 = vsel %vm329_vm12, %v340_v50, %v342_v54 }
 0x175   :  { %v709_v49 = vmul.u32.u64.low %v344_v58, %v339_v62  ;;  %v710_v2 = vmul.u32.u64.high %v344_v58, %v339_v62, %v709_v49  ;;  %v716_v5 = vmul.u32.u64.low %v344_v58, %v343_v0  ;;  %v717_v6 = vmul.u32.u64.high %v344_v58, %v343_v0, %v716_v5 }
 0x176   :  { %v231_v10 = vsel %vm225_vm9, %v228_v1, %v230_v3  ;;  %v250_v8 = vadd.s32 1, %v696_v57  ;;  %vm249_vm13 = vc.u32 %v699_v60, %v695_v56  ;;  %v334_v12 = vsel %vm330_vm11, %v318_v38, %v333_v9 }
 0x177   :  { %v247_v53 = vmul.u32 %v240_v42, %v231_v10  ;;  %v335_v14 = vsel %vm329_vm12, %v332_v11, %v334_v12  ;;  %v354_v15 = vadd.s32 1, %v710_v2  ;;  %vm353_vm14 = vc.u32 %v717_v6, %v709_v49 }
 0x178   :  { %v251_v61 = vsel %vm249_vm13, %v250_v8, %v696_v57  ;;  %v351_v16 = vmul.u32 %v344_v58, %v335_v14  ;;  %v248_v41 = vadd.s32 %v695_v56, %v699_v60  ;;  %v352_v48 = vadd.s32 %v709_v49, %v717_v6 }
 0x179   :  { %v252_v52 = vadd.s32 %v251_v61, %v247_v53  ;;  %v355_v17 = vsel %vm353_vm14, %v354_v15, %v710_v2  ;;  %vm284_vm10 = vweird.f32 %v615_v25  ;;  %vm388_vm12 = vweird.f32 %v620_v31 }
 0x17a   :  { %v356_v19 = vadd.s32 %v355_v17, %v351_v16  ;;  %vm410_vm13 = vcmask 257024  }
 0x17b   :  { %v253_v18 = vadd.s32 536870912, %v252_v52 }
 0x17c   :  { %v357_v21 = vadd.s32 536870912, %v356_v19 }
 0x17d   :  { %v254_v20 = vshrl.u32 %v253_v18, 30 }
 0x17e   :  { %v735_v23 = vshrl.u32 %v357_v21, 30 }
 0x17f   :  { %v255_v22 = vshll.u32 %v254_v20, 30  ;;  %v278_v11 = vsub.s32 4, %v254_v20 }
 0x180   :  { %v359_v26 = vshll.u32 %v735_v23, 30  ;;  %v382_v14 = vsub.s32 4, %v735_v23 }
 0x181   :  { %v256_v24 = vsub.s32 %v252_v52, %v255_v22  ;;  %v279_v61 = vsel %vm194_vm1, %v278_v11, %v254_v20 }
 0x182   :  { %v360_v27 = vsub.s32 %v356_v19, %v359_v26  ;;  %v281_v52 = vsel %vm743_vm2, 0, %v279_v61  ;;  %v383_v17 = vsel %vm298_vm3, %v382_v14, %v735_v23 }
 0x183   :  { %v258_v13 = vsub.s32 0, %v256_v24  ;;  %v285_v19 = vadd.s32 3, %v281_v52  ;;  %v385_v20 = vsel %vm753_vm4, 0, %v383_v17 }
 0x184   :  { %v362_v30 = vsub.s32 0, %v360_v27 }
 0x185   :  { %v443_v28 = vmin.u32 %v258_v13, %v256_v24  ;;  %v286_v26 = vand.u32 3, %v285_v19  ;;  %v389_v13 = vadd.s32 3, %v385_v20 }
 0x186   :  { %v447_v33 = vmin.u32 %v362_v30, %v360_v27 }
 0x187   :  { %v260_v32 = vclz %v443_v28  ;;  %vm288_vm5 = vcmp.eq.s32.totalorder %v286_v26, 0  ;;  %vm291_vm6 = vcmp.eq.s32.totalorder %v286_v26, 2  ;;  %vm287_vm7 = vcmp.lt.s32.totalorder %v286_v26, 2 }
 0x188   :  { %v364_v36 = vclz %v447_v33  ;;  %v390_v33 = vand.u32 3, %v389_v13 }
 0x189   :  { %v444_v34 = vadd.s32 4294967294, %v260_v32 }
 0x18a   :  { %v448_v37 = vadd.s32 4294967294, %v364_v36  ;;  %vm392_vm8 = vcmp.eq.s32.totalorder %v390_v33, 0  ;;  %vm395_vm9 = vcmp.eq.s32.totalorder %v390_v33, 2  ;;  %vm391_vm11 = vcmp.lt.s32.totalorder %v390_v33, 2 }
 0x18b   :  { %vm445_vm15 = vcmp.lt.s32.totalorder %v444_v34, 0 }
 0x18c   :  { %v263_v38 = vsel %vm445_vm15, 0, %v444_v34  ;;  %vm449_vm0 = vcmp.lt.s32.totalorder %v448_v37, 0  ;;  %v438_v34 = vld [vmem:[%s786_s3 + $0x1] ss:$0 sm:$0xff] }
 0x18d   :  { %v268_v39 = vsub.s32 4294967266, %v263_v38  ;;  %v367_v40 = vsel %vm449_vm0, 0, %v448_v37  ;;  %v264_v42 = vsub.s32 32, %v263_v38  ;;  %v265_v45 = vshll.u32 %v256_v24, %v263_v38 }
 0x18e   :  { %v372_v44 = vsub.s32 4294967266, %v367_v40  ;;  %v368_v50 = vsub.s32 32, %v367_v40  ;;  %v369_v58 = vshll.u32 %v360_v27, %v367_v40 }
 0x18f   :  { %v269_v43 = vadd.s32 127, %v268_v39  ;;  %v266_v46 = vshrl.u32 %v248_v41, %v264_v42  ;;  %v439_v41 = vld [vmem:[%s786_s3 + $0x2] ss:$0 sm:$0xff]  ;;  %s549_s3 = smov [#allocation2]  }
 0x190   :  { %v373_v54 = vadd.s32 127, %v372_v44  ;;  %v370_v59 = vshrl.u32 %v352_v48, %v368_v50  ;;  %s418_s14 = sshll.u32 %s549_s3, 4  ;;  %s419_s14 = int_to_ptr.vmem [resolvable:$true] %s418_s14 }
 0x191   :  { %v270_v47 = vshll.u32 %v269_v43, 23  ;;  %v267_v55 = vor.u32 %v266_v46, %v265_v45  ;;  %s518_s15 = scalar_lea.vmem %s419_s14, 128  ;;  %p523_p1 = scmp.lt.s32.totalorder %s419_s14, %s419_s14 }
 0x192   :  { %v374_v62 = vshll.u32 %v373_v54, 23  ;;  %v371_v1 = vor.u32 %v370_v59, %v369_v58  ;;  %p519_p0 = scmp.ne.s32.totalorder %s419_s14, %s518_s15  ;;  %p524_p2 = scmp.lt.s32.totalorder %s518_s15, %s518_s15 }
 0x193   :  { %v271_v57 = vor.u32 4788187, %v270_v47  ;;  %v274_v0 = vcvt.s32.f32 %v267_v55 }
 0x194   :  { %v375_v2 = vor.u32 4788187, %v374_v62  ;;  %v378_v3 = vcvt.s32.f32 %v371_v1  ;;  %p525_p3 = por %p524_p2, %p523_p1 }
 0x195   :  { %v272_v63 = vand.u32 2147483647, %v271_v57 }
 0x196   :  { %v376_v60 = vand.u32 2147483647, %v375_v2  ;;  %p526_p4 = pnand %p525_p3, %p519_p0 }
 0x197   :  { %v275_v56 = vmul.f32 %v274_v0, %v272_v63 }
 0x198   :  { %v379_v5 = vmul.f32 %v378_v3, %v376_v60 }
 0x199   :  { %v276_v4 = vxor.u32 2147483648, %v275_v56 }
 0x19a   :  { %v380_v9 = vxor.u32 2147483648, %v379_v5 }
 0x19b   :  { %v277_v6 = vsel %vm194_vm1, %v276_v4, %v275_v56 }
 0x19c   :  { %v280_v10 = vsel %vm743_vm2, %v615_v25, %v277_v6  ;;  %v381_v51 = vsel %vm298_vm3, %v380_v9, %v379_v5 }
 0x19d   :  { %506 = vcosq.f32 %v280_v10  ;;  %v384_v12 = vsel %vm753_vm4, %v620_v31, %v381_v51 }
 0x19e   :  { %508 = vsinq.f32 %v280_v10 }
 0x19f   :  { %510 = vcosq.f32 %v384_v12 }
 0x1a0   :  { %512 = vsinq.f32 %v384_v12 }
 0x1aa   :  { %v507_v22 = vpop.eup %506 }
 0x1ab   :  { %v509_v24 = vpop.eup %508  ;;  %v292_v30 = vxor.u32 2147483648, %v507_v22 }
 0x1ac   :  { %v511_v27 = vpop.eup %510  ;;  %v289_v28 = vxor.u32 2147483648, %v509_v24 }
 0x1ad   :  { %v513_v32 = vpop.eup %512  ;;  %v293_v37 = vsel %vm291_vm6, %v292_v30, %v509_v24  ;;  %v396_v39 = vxor.u32 2147483648, %v511_v27 }
 0x1ae   :  { %v290_v36 = vsel %vm288_vm5, %v507_v22, %v289_v28  ;;  %v393_v38 = vxor.u32 2147483648, %v513_v32 }
 0x1af   :  { %v294_v43 = vsel %vm287_vm7, %v290_v36, %v293_v37  ;;  %v397_v46 = vsel %vm395_vm9, %v396_v39, %v513_v32 }
 0x1b0   :  { %v394_v45 = vsel %vm392_vm8, %v511_v27, %v393_v38  ;;  %v295_v50 = vsel %vm284_vm10, nan, %v294_v43 }
 0x1f7   :  { %v140_v53 = vpop.xlane.xlu0 %139 }
 0x1f8   :  { %v144_v15 = vmul.f32 0.03125, %v140_v53 }
 0x1fa   :  { %v146_v7 = vadd.f32 1e-05, %v144_v15 }
 0x1fb   :  { %v143_v16 = vpop.xlane.xlu1 %142 }
 0x1fc   :  { %514 = vrsqrt.f32 %v146_v7  ;;  %v145_v18 = vmul.f32 0.03125, %v143_v16 }
 0x1fe   :  { %v147_v21 = vadd.f32 1e-05, %v145_v18 }
 0x200   :  { %516 = vrsqrt.f32 %v147_v21 }
 0x209   :  { %v515_v23 = vpop.eup %514 }
 0x20a   :  { %v150_v40 = vmul.f32 %v515_v23, %v617_v29  ;;  %v398_v29 = vsel %vm391_vm11, %v394_v45, %v397_v46 }
 0x20b   :  { %v399_v25 = vsel %vm388_vm12, nan, %v398_v29 }
 0x20c   :  { %v157_v42 = vmul.f32 %v438_v34, %v150_v40 }
 0x20d   :  { %v517_v44 = vpop.eup %516 }
 0x20e   :  { %v151_v47 = vmul.f32 %v517_v44, %v624_v35  ;;  %v164_v48 = vadd.f32 %v439_v41, %v157_v42 }
 0x210   :  { %v158_v54 = vmul.f32 %v438_v34, %v151_v47  ;;  %v400_v55 = vadd.f32 %v295_v50, %v164_v48 }
 0x212   :  { %v165_v57 = vadd.f32 %v439_v41, %v158_v54  ;;  %v452_v58 = vpack.c.bf16 %v400_v55, %v400_v55 }
 0x214   :  { %v401_v59 = vadd.f32 %v399_v25, %v165_v57  ;;  %411 = vst.msk [vmem:[#allocation2] sm:$0xf] %vm410_vm13, %v452_v58 }
 0x216   :  { %v453_v62 = vpack.c.bf16 %v401_v59, %v401_v59 }
 0x218   :  { %412 = vst.msk [vmem:[#allocation2 + $0x4] sm:$0xf] %vm410_vm13, %v453_v62 }
 0x219   :  { %529 = shalt.err (!%p526_p4)
}
 0x21a   :  { %s550_s16 = smov 64   ;;  %s551_s17 = smov 4  }
 0x21b   :  { %424 = dma.vmem_to_hbm [thread:$0]  %s419_s14, 128, %s787_s4, [#allocation3], %s550_s16, %s550_s16, %s551_s17  }
 0x21c   :  { %538 = dma.done.wait [#allocation3], 128  }
 0x21d   :  { %539 = vsyncadd [#allocation3], 4294967168 }
 0x21e   :  { %428 = vsyncpa [#allocation3], 1 }

</bundles_post_ra>
